<compile_context>
chip_gen: v5e
topology: v5e:2x2
jax: 0.10.0
libtpu: 0.0.40
codegen_flags: <defaults>
</compile_context>

<pallas_src>
import functools

import jax
import jax.numpy as jnp
from jax.experimental import pallas as pl
from jax.experimental.pallas import tpu as pltpu

_LANE = 128


def _mf_dot_kernel(u_ref, v_ref, o_ref):
    # u_ref, v_ref: (F, tb) tiles — factors on sublanes, batch on lanes (VMEM).
    # o_ref: (1, tb) lane-dense per-row dot products.
    u = u_ref[...]
    v = v_ref[...]
    if u.dtype != jnp.float32:          # trace-time check; no-op for f32 tables
        u = u.astype(jnp.float32)
        v = v.astype(jnp.float32)
    # VPU multiply + XLU sublane reduction over F(<=24) sublanes; nowhere near
    # saturating either slot — the kernel is DMA/launch bound by design.
    o_ref[...] = jnp.sum(u * v, axis=0, keepdims=True).astype(o_ref.dtype)


@functools.partial(jax.jit, static_argnames=("tb",))
def mf_forward(U, V, user, item, tb=16384):
    """Pallas implementation of MF.forward(user, item) -> (B,) predictions."""
    B = user.shape[0]
    F = U.shape[1]

    if B == 0:  # degenerate batch: avoid a zero-size grid
        return jnp.zeros((0,), U.dtype)

    # ---- batch tiling: single block whenever the (lane-rounded) batch fits
    # the cap; otherwise large multiple-of-128 tiles so step overhead is <10%.
    tb_cap = max(_LANE, (tb // _LANE) * _LANE)
    b_lanes = pl.cdiv(B, _LANE) * _LANE
    if b_lanes <= tb_cap:
        tb_eff, n_blk = b_lanes, 1           # v5e/v6e: no grid-loop overhead
    else:
        tb_eff = tb_cap
        n_blk = pl.cdiv(B, tb_eff)           # v7x note: ideally an even count
    Bp = n_blk * tb_eff

    # ---- pad the cheap int32 index vectors (not the gathered f32 data).
    # Index 0 is a valid row; the padded predictions are sliced off below.
    pad = Bp - B
    user_p = jnp.pad(user, (0, pad)) if pad else user
    item_p = jnp.pad(item, (0, pad)) if pad else item

    # ---- embedding-row gather (index glue) in XLA, transposed so the batch
    # lands on the 128-lane axis for the kernel (layout plumbing only).
    u_t = jnp.take(U, user_p, axis=0).T   # (F, Bp)
    v_t = jnp.take(V, item_p, axis=0).T   # (F, Bp)

    out = pl.pallas_call(
        _mf_dot_kernel,
        out_shape=jax.ShapeDtypeStruct((1, Bp), U.dtype),
        grid_spec=pl.GridSpec(
            grid=(n_blk,),
            in_specs=[
                pl.BlockSpec((F, tb_eff), lambda i: (0, i)),
                pl.BlockSpec((F, tb_eff), lambda i: (0, i)),
            ],
            out_specs=pl.BlockSpec((1, tb_eff), lambda i: (0, i)),
        ),
        compiler_params=pltpu.CompilerParams(
            # Batch blocks are independent -> megacore sharding on v7x.
            dimension_semantics=("parallel",),
            # 2 inputs x 2 buffers x (24 x tb x 4 B) + output <= ~8 MiB at
            # tb=16384: fits the 32 MiB scoped budget and is re-derived
            # against v7x's 64 MiB physical VMEM (half of v5e/v6e).
            vmem_limit_bytes=32 * 1024 * 1024,
        ),
    )(u_t, v_t)

    # (B,) predictions.  On v5e keep an eye that this tiny slice fuses into
    # the consumer; callers that want zero extra copies can take the slab.
    return out[0, :B]


if __name__ == "__main__":
    # Module defaults (tables are tiny: 6050x20 and 4050x20 f32 ~ 0.8 MiB total).
    n_users, m_items, n_factors = 6050, 4050, 20
    batch = 1000   # -> single (20, 1024) block: no grid-loop overhead

    key = jax.random.PRNGKey(0)
    ku, kv, kuser, kitem = jax.random.split(key, 4)

    # Parameters: uniform(-0.005, 0.005), matching U.data.uniform_(-0.005, 0.005).
    U = jax.random.uniform(ku, (n_users, n_factors), jnp.float32,
                           minval=-0.005, maxval=0.005)
    V = jax.random.uniform(kv, (m_items, n_factors), jnp.float32,
                           minval=-0.005, maxval=0.005)

    user = jax.random.randint(kuser, (batch,), 0, n_users, dtype=jnp.int32)
    item = jax.random.randint(kitem, (batch,), 0, m_items, dtype=jnp.int32)

    pred = jax.block_until_ready(mf_forward(U, V, user, item))

    # Sanity check against a pure-JAX reference of the einsum.
    ref = jnp.einsum("ij,ij->i", U[user], V[item])
    assert pred.shape == (batch,)
    assert jnp.allclose(pred, ref, rtol=1e-5, atol=1e-8), (
        float(jnp.max(jnp.abs(pred - ref))))

    print("KERNEL_OK")
</pallas_src>

<mosaic_0001>
module attributes {stable_mosaic.version = 11 : i64} {
  func.func @_mf_dot_kernel(%arg0: i32, %arg1: memref<20x1024xf32, #tpu.memory_space<vmem>>, %arg2: memref<20x1024xf32, #tpu.memory_space<vmem>>, %arg3: memref<1x1024xf32, #tpu.memory_space<vmem>>) attributes {dimension_semantics = [#tpu.dimension_semantics<parallel>], iteration_bounds = array<i64: 1>, scalar_prefetch = 0 : i64, scratch_operands = 0 : i64, tpu.core_type = #tpu.core_type<tc>, window_params = [{transform_indices = @transform_0, window_bounds = array<i64: 20, 1024>}, {transform_indices = @transform_1, window_bounds = array<i64: 20, 1024>}, {transform_indices = @transform_2, window_bounds = array<i64: 1, 1024>}]} {
    %c0 = arith.constant 0 : index
    %c0_0 = arith.constant 0 : index
    %0 = vector.load %arg1[%c0, %c0_0] : memref<20x1024xf32, #tpu.memory_space<vmem>>, vector<20x1024xf32>
    %c0_1 = arith.constant 0 : index
    %c0_2 = arith.constant 0 : index
    %1 = vector.load %arg2[%c0_1, %c0_2] : memref<20x1024xf32, #tpu.memory_space<vmem>>, vector<20x1024xf32>
    %2 = arith.mulf %0, %1 : vector<20x1024xf32>
    %cst = arith.constant dense<0.000000e+00> : vector<1024xf32>
    %3 = vector.multi_reduction <add>, %2, %cst [0] : vector<20x1024xf32> to vector<1024xf32>
    %4 = vector.shape_cast %3 : vector<1024xf32> to vector<1x1024xf32>
    %c0_3 = arith.constant 0 : index
    %c0_4 = arith.constant 0 : index
    %5 = vector.load %arg3[%c0_3, %c0_4] : memref<1x1024xf32, #tpu.memory_space<vmem>>, vector<1x1024xf32>
    tpu.vector_store %arg3[%c0_3, %c0_4], %4 {strides = array<i32>} : memref<1x1024xf32, #tpu.memory_space<vmem>>, vector<1x1024xf32>,
    return
  }
  func.func @transform_0(%arg0: i32) -> (i32, i32) {
    %c0_i32 = arith.constant 0 : i32
    %c0_i32_0 = arith.constant 0 : i32
    return %c0_i32, %arg0 : i32, i32
  }
  func.func @transform_1(%arg0: i32) -> (i32, i32) {
    %c0_i32 = arith.constant 0 : i32
    %c0_i32_0 = arith.constant 0 : i32
    return %c0_i32, %arg0 : i32, i32
  }
  func.func @transform_2(%arg0: i32) -> (i32, i32) {
    %c0_i32 = arith.constant 0 : i32
    %c0_i32_0 = arith.constant 0 : i32
    return %c0_i32, %arg0 : i32, i32
  }
}

</mosaic_0001>

<bundles_post_ra>
// kernel: mf_forward.1
= control target key start
LH: loop header
LB: loop body
LE: loop exit
PB: predicated region body
PF: predicated region fallthrough
CT: control target
= control target key end

     0   :  { %7 = vsyncpa [#allocation3], 0  ;;  %vm85_vm0 = vcmask 1043456   ;;  %vm172_vm1 = vcmask 1040384   ;;  %vm174_vm2 = vcmask 1042434   ;;  %vm176_vm3 = vcmask 1041408   ;;  %s402_s0 = inlined_call_operand.vmem [shape: f32[20,1024], index: 0, kind: input, shape index: {}]   ;;  %s403_s1 = inlined_call_operand.vmem [shape: f32[20,1024], index: 1, kind: input, shape index: {}]   ;;  %s404_s2 = inlined_call_operand.hbm [shape: f32[1,1024], index: 2, kind: output, shape index: {}]  }
   0x1   :  { %v12_v0 = vld [vmem:[%s402_s0] sm:$0xff]  ;;  %v13_v1 = vld [vmem:[%s402_s0 + $0x8] sm:$0xff]  ;;  %v14_v2 = vld [vmem:[%s402_s0 + $0x10] sm:$0xff]  ;;  %vm178_vm4 = vcmask 1044484   ;;  %vm180_vm5 = vcmask 1046534   ;;  %vm182_vm6 = vcmask 1045508  }
   0x2   :  { %v15_v3 = vld [vmem:[%s402_s0 + $0x18] sm:$0xff]  ;;  %v16_v4 = vld [vmem:[%s402_s0 + $0x20] sm:$0xff]  ;;  %v17_v5 = vld [vmem:[%s402_s0 + $0x28] sm:$0xff]  ;;  %s194_s23 = sshll.u32 %s404_s2, 4  ;;  %s195_s23 = int_to_ptr.hbm [resolvable:$true] %s194_s23 }
   0x3   :  { %v18_v6 = vld [vmem:[%s402_s0 + $0x30] sm:$0xff]  ;;  %v19_v7 = vld [vmem:[%s402_s0 + $0x38] sm:$0xff]  ;;  %v20_v8 = vld [vmem:[%s402_s0 + $0x40] sm:$0xff] }
   0x4   :  { %v21_v9 = vld [vmem:[%s402_s0 + $0x48] sm:$0xff]  ;;  %v22_v10 = vld [vmem:[%s402_s0 + $0x50] sm:$0xff]  ;;  %v23_v11 = vld [vmem:[%s402_s0 + $0x58] sm:$0xff] }
   0x5   :  { %v24_v12 = vld [vmem:[%s402_s0 + $0x60] sm:$0xff]  ;;  %v25_v13 = vld [vmem:[%s402_s0 + $0x68] sm:$0xff]  ;;  %v26_v16 = vld [vmem:[%s402_s0 + $0x70] sm:$0xff] }
   0x6   :  { %v36_v14 = vld [vmem:[%s403_s1] sm:$0xff]  ;;  %v37_v15 = vld [vmem:[%s403_s1 + $0x8] sm:$0xff]  ;;  %v27_v17 = vld [vmem:[%s402_s0 + $0x78] sm:$0xff] }
   0x7   :  { %v28_v18 = vld [vmem:[%s402_s0 + $0x80] sm:$0xf]  ;;  %v38_v19 = vld [vmem:[%s403_s1 + $0x10] sm:$0xff]  ;;  %v39_v20 = vld [vmem:[%s403_s1 + $0x18] sm:$0xff]  ;;  %v60_v28 = vmul.f32 %v36_v14, %v12_v0  ;;  %v61_v29 = vmul.f32 %v37_v15, %v13_v1 }
   0x8   :  { %v40_v21 = vld [vmem:[%s403_s1 + $0x20] sm:$0xff]  ;;  %v29_v22 = vld [vmem:[%s402_s0 + $0x88] sm:$0xf]  ;;  %v30_v23 = vld [vmem:[%s402_s0 + $0x90] sm:$0xf]  ;;  %v62_v36 = vmul.f32 %v38_v19, %v14_v2  ;;  %v63_v37 = vmul.f32 %v39_v20, %v15_v3 }
   0x9   :  { %v31_v24 = vld [vmem:[%s402_s0 + $0x98] sm:$0xf]  ;;  %v41_v25 = vld [vmem:[%s403_s1 + $0x28] sm:$0xff]  ;;  %v42_v26 = vld [vmem:[%s403_s1 + $0x30] sm:$0xff]  ;;  %v64_v38 = vmul.f32 %v40_v21, %v16_v4 }
   0xa   :  { %v43_v27 = vld [vmem:[%s403_s1 + $0x38] sm:$0xff]  ;;  %v32_v30 = vld [vmem:[%s402_s0 + $0xa0] sm:$0xf]  ;;  %v33_v31 = vld [vmem:[%s402_s0 + $0xa8] sm:$0xf]  ;;  %v65_v39 = vmul.f32 %v41_v25, %v17_v5  ;;  %v66_v44 = vmul.f32 %v42_v26, %v18_v6 }
   0xb   :  { %v34_v32 = vld [vmem:[%s402_s0 + $0xb0] sm:$0xf]  ;;  %v44_v33 = vld [vmem:[%s403_s1 + $0x40] sm:$0xff]  ;;  %v45_v34 = vld [vmem:[%s403_s1 + $0x48] sm:$0xff]  ;;  %v67_v45 = vmul.f32 %v43_v27, %v19_v7 }
   0xc   :  { %v46_v35 = vld [vmem:[%s403_s1 + $0x50] sm:$0xff]  ;;  %v35_v40 = vld [vmem:[%s402_s0 + $0xb8] sm:$0xf]  ;;  %v48_v42 = vld [vmem:[%s403_s1 + $0x60] sm:$0xff]  ;;  %v68_v46 = vmul.f32 %v44_v33, %v20_v8  ;;  %v69_v47 = vmul.f32 %v45_v34, %v21_v9 }
   0xd   :  { %v47_v41 = vld [vmem:[%s403_s1 + $0x58] sm:$0xff]  ;;  %v49_v43 = vld [vmem:[%s403_s1 + $0x68] sm:$0xff]  ;;  %v50_v48 = vld [vmem:[%s403_s1 + $0x70] sm:$0xff]  ;;  %v70_v51 = vmul.f32 %v46_v35, %v22_v10  ;;  %v72_v53 = vmul.f32 %v48_v42, %v24_v12 }
   0xe   :  { %v51_v49 = vld [vmem:[%s403_s1 + $0x78] sm:$0xff]  ;;  %v52_v50 = vld [vmem:[%s403_s1 + $0x80] sm:$0xf]  ;;  %v71_v52 = vmul.f32 %v47_v41, %v23_v11  ;;  %v73_v54 = vmul.f32 %v49_v43, %v25_v13  ;;  %v53_v55 = vld [vmem:[%s403_s1 + $0x88] sm:$0xf]  ;;  %v74_v58 = vmul.f32 %v50_v48, %v26_v16  ;;  %v84_v61 = vadd.f32 %v68_v46, %v60_v28 }
   0xf   :  { %v54_v56 = vld [vmem:[%s403_s1 + $0x90] sm:$0xf]  ;;  %v55_v57 = vld [vmem:[%s403_s1 + $0x98] sm:$0xf]  ;;  %v75_v59 = vmul.f32 %v51_v49, %v27_v17  ;;  %v76_v60 = vmul.f32 %v52_v50, %v28_v18  ;;  %v56_v62 = vld [vmem:[%s403_s1 + $0xa0] sm:$0xf]  ;;  %v77_v1 = vmul.f32 %v53_v55, %v29_v22  ;;  %v94_v4 = vadd.f32 %v69_v47, %v61_v29 }
  0x10   :  { %v57_v63 = vld [vmem:[%s403_s1 + $0xa8] sm:$0xf]  ;;  %v58_v0 = vld [vmem:[%s403_s1 + $0xb0] sm:$0xf]  ;;  %v78_v2 = vmul.f32 %v54_v56, %v30_v23  ;;  %v79_v3 = vmul.f32 %v55_v57, %v31_v24  ;;  %v59_v5 = vld [vmem:[%s403_s1 + $0xb8] sm:$0xf]  ;;  %v80_v6 = vmul.f32 %v56_v62, %v32_v30  ;;  %v103_v13 = vadd.f32 %v70_v51, %v62_v36 }
  0x11   :  { %v81_v7 = vmul.f32 %v57_v63, %v33_v31  ;;  %v82_v8 = vmul.f32 %v58_v0, %v34_v32  ;;  %v86_v9 = vsel %vm85_vm0, %v76_v60, 0.0  ;;  %v83_v10 = vmul.f32 %v59_v5, %v35_v40  ;;  %s230_s1 = smov [#allocation2]  }
  0x12   :  { %v87_v11 = vadd.f32 %v86_v9, %v84_v61  ;;  %v95_v12 = vsel %vm85_vm0, %v77_v1, 0.0  ;;  %v104_v15 = vsel %vm85_vm0, %v78_v2, 0.0  ;;  %v112_v16 = vadd.f32 %v71_v52, %v63_v37  ;;  %s192_s20 = sshll.u32 %s230_s1, 4  ;;  %s193_s20 = int_to_ptr.vmem [resolvable:$true] %s192_s20 }
  0x13   :  { %v96_v14 = vadd.f32 %v95_v12, %v94_v4  ;;  %v113_v17 = vsel %vm85_vm0, %v79_v3, 0.0  ;;  %v105_v19 = vadd.f32 %v104_v15, %v103_v13  ;;  %v121_v20 = vadd.f32 %v72_v53, %v64_v38 }
  0x14   :  { %v88_v18 = vrot.slane %v87_v11, 4  ;;  %v122_v21 = vsel %vm85_vm0, %v80_v6, 0.0  ;;  %v114_v23 = vadd.f32 %v113_v17, %v112_v16  ;;  %v130_v24 = vadd.f32 %v73_v54, %v65_v39 }
  0x15   :  { %v97_v22 = vrot.slane %v96_v14, 4  ;;  %v131_v25 = vsel %vm85_vm0, %v81_v7, 0.0  ;;  %v106_v27 = vrot.slane %v105_v19, 4  ;;  %v123_v28 = vadd.f32 %v122_v21, %v121_v20 }
  0x16   :  { %v89_v26 = vadd.f32 %v88_v18, %v87_v11  ;;  %v139_v29 = vadd.f32 %v74_v58, %v66_v44  ;;  %v115_v31 = vrot.slane %v114_v23, 4  ;;  %v132_v32 = vadd.f32 %v131_v25, %v130_v24 }
  0x17   :  { %v98_v30 = vadd.f32 %v97_v22, %v96_v14  ;;  %v140_v33 = vsel %vm85_vm0, %v82_v8, 0.0  ;;  %v107_v35 = vadd.f32 %v106_v27, %v105_v19  ;;  %v124_v36 = vrot.slane %v123_v28, 4 }
  0x18   :  { %v90_v34 = vrot.slane %v89_v26, 2  ;;  %v141_v37 = vadd.f32 %v140_v33, %v139_v29  ;;  %v116_v40 = vadd.f32 %v115_v31, %v114_v23  ;;  %v133_v41 = vrot.slane %v132_v32, 4 }
  0x19   :  { %v99_v38 = vrot.slane %v98_v30, 2  ;;  %v148_v42 = vadd.f32 %v75_v59, %v67_v45  ;;  %v108_v39 = vrot.slane %v107_v35, 2  ;;  %v125_v43 = vadd.f32 %v124_v36, %v123_v28 }
  0x1a   :  { %v142_v46 = vrot.slane %v141_v37, 4  ;;  %v117_v48 = vrot.slane %v116_v40, 2  ;;  %v134_v49 = vadd.f32 %v133_v41, %v132_v32  ;;  %v149_v44 = vsel %vm85_vm0, %v83_v10, 0.0 }
  0x1b   :  { %v100_v47 = vadd.f32 %v99_v38, %v98_v30  ;;  %v91_v50 = vadd.f32 %v90_v34, %v89_v26  ;;  %v109_v51 = vadd.f32 %v108_v39, %v107_v35  ;;  %v126_v52 = vrot.slane %v125_v43, 2 }
  0x1c   :  { %v143_v53 = vadd.f32 %v142_v46, %v141_v37  ;;  %v118_v55 = vadd.f32 %v117_v48, %v116_v40  ;;  %v135_v56 = vrot.slane %v134_v49, 2  ;;  %v150_v57 = vadd.f32 %v149_v44, %v148_v42 }
  0x1d   :  { %v101_v54 = vrot.slane %v100_v47, 1  ;;  %v110_v58 = vrot.slane %v109_v51, 1  ;;  %v127_v60 = vadd.f32 %v126_v52, %v125_v43  ;;  %v92_v63 = vrot.slane %v91_v50, 1 }
  0x1e   :  { %v144_v61 = vrot.slane %v143_v53, 2  ;;  %v119_v45 = vrot.slane %v118_v55, 1  ;;  %v136_v59 = vadd.f32 %v135_v56, %v134_v49  ;;  %v151_v62 = vrot.slane %v150_v57, 4 }
  0x1f   :  { %v102_v0 = vadd.f32 %v101_v54, %v100_v47  ;;  %v128_v1 = vrot.slane %v127_v60, 1  ;;  %v111_v3 = vadd.f32 %v110_v58, %v109_v51  ;;  %v93_v11 = vadd.f32 %v92_v63, %v91_v50 }
  0x20   :  { %v145_v2 = vadd.f32 %v144_v61, %v143_v53  ;;  %v120_v4 = vadd.f32 %v119_v45, %v118_v55  ;;  %v137_v5 = vrot.slane %v136_v59, 1  ;;  %v152_v6 = vadd.f32 %v151_v62, %v150_v57 }
  0x21   :  { %v129_v8 = vadd.f32 %v128_v1, %v127_v60  ;;  %v165_v12 = vrot.slane %v102_v0, 7  ;;  %v166_v15 = vrot.slane %v111_v3, 6 }
  0x22   :  { %v146_v7 = vrot.slane %v145_v2, 1  ;;  %v138_v9 = vadd.f32 %v137_v5, %v136_v59  ;;  %v153_v10 = vrot.slane %v152_v6, 2  ;;  %v167_v16 = vrot.slane %v120_v4, 5 }
  0x23   :  { %v168_v18 = vrot.slane %v129_v8, 4  ;;  %v173_v22 = vsel %vm172_vm1, %v93_v11, %v165_v12 }
  0x24   :  { %v147_v13 = vadd.f32 %v146_v7, %v145_v2  ;;  %v154_v14 = vadd.f32 %v153_v10, %v152_v6  ;;  %v169_v19 = vrot.slane %v138_v9, 3  ;;  %v175_v23 = vsel %vm174_vm2, %v166_v15, %v167_v16 }
  0x25   :  { %v177_v26 = vsel %vm176_vm3, %v173_v22, %v175_v23 }
  0x26   :  { %v155_v17 = vrot.slane %v154_v14, 1  ;;  %v170_v21 = vrot.slane %v147_v13, 2  ;;  %v179_v25 = vsel %vm178_vm4, %v168_v18, %v169_v19 }
  0x28   :  { %v156_v20 = vadd.f32 %v155_v17, %v154_v14 }
  0x2a   :  { %v171_v24 = vrot.slane %v156_v20, 1 }
  0x2c   :  { %v181_v27 = vsel %vm180_vm5, %v170_v21, %v171_v24 }
  0x2d   :  { %v183_v28 = vsel %vm182_vm6, %v179_v25, %v181_v27 }
  0x2e   :  { %v184_v29 = vsel %vm85_vm0, %v177_v26, %v183_v28 }
  0x2f   :  { %186 = vst [vmem:[#allocation2] sm:$0xff] %v184_v29 }
  0x30   :  { %197 = dma.vmem_to_hbm [thread:$0]  %s193_s20, 128, %s195_s23, [#allocation3]  }
  0x31   :  { %228 = dma.done.wait [#allocation3], 128  }
  0x32   :  { %229 = vsyncadd [#allocation3], 4294967168 }
  0x33   :  { %202 = vsyncpa [#allocation3], 1 }

</bundles_post_ra>
